<compile_context>
chip_gen: v7x
topology: tpu7x:2x2x1
jax: 0.10.0
libtpu: 0.0.40
codegen_flags: <defaults>
</compile_context>

<pallas_src>
import functools
import math

import jax
import jax.numpy as jnp
from jax.experimental import pallas as pl
from jax.experimental.pallas import tpu as pltpu

EPS = 1e-12  # F.normalize default eps


def _round_up(x, m):
    return ((x + m - 1) // m) * m


def _norm_classifier_kernel(feat_ref, w_ref, winv_ref, logits_ref, featn_ref, acc_ref,
                            *, hw_total, thw, acc_lanes, n_groups, n_hw, ragged_hw):
    """Grid: (batch_tiles, hw_chunks); HW is the last ("arbitrary") reduction axis.

    Per HW chunk: fold THW lanes down to `acc_lanes` with lane-aligned slices + VPU adds
    and accumulate into `acc_ref`. On the last chunk: collapse lanes once, normalize the
    pooled feature, and run the cosine matmul on the MXU with a per-column scale.
    """
    hw_step = pl.program_id(1)

    def fold(chunk):
        psum = chunk[:, :, 0:acc_lanes]
        for g in range(1, n_groups):
            psum = psum + chunk[:, :, g * acc_lanes:(g + 1) * acc_lanes]
        return psum

    def accumulate(chunk_f32):
        psum = fold(chunk_f32)

        @pl.when(hw_step == 0)
        def _write():                      # write (not zero+add) on the first chunk
            acc_ref[...] = psum

        @pl.when(hw_step != 0)
        def _add():
            acc_ref[...] += psum

    if ragged_hw:
        is_last = hw_step == n_hw - 1

        @pl.when(jnp.logical_not(is_last))
        def _steady():                     # full chunks: no mask work in steady state
            accumulate(feat_ref[...].astype(jnp.float32))

        @pl.when(is_last)
        def _tail():                       # only the final partial chunk pays the mask
            pos = hw_step * thw + jax.lax.broadcasted_iota(jnp.int32, (1, 1, thw), 2)
            chunk = jnp.where(pos < hw_total, feat_ref[...].astype(jnp.float32), 0.0)
            accumulate(chunk)
    else:
        accumulate(feat_ref[...].astype(jnp.float32))

    @pl.when(hw_step == n_hw - 1)
    def _finalize():
        # Single cross-lane collapse of the lane-group accumulator -> (TB, C), C on lanes.
        pooled = jnp.sum(acc_ref[...], axis=-1) * jnp.float32(1.0 / hw_total)

        # F.normalize(feat, dim=1): x * rsqrt(max(sum(x^2), eps^2)) == x / max(||x||, eps)
        fsq = jnp.sum(pooled * pooled, axis=-1, keepdims=True)
        feat_n = pooled * jax.lax.rsqrt(jnp.maximum(fsq, jnp.float32(EPS * EPS)))
        featn_ref[...] = feat_n

        # Cosine logits: raw (pre-transposed, lane-padded) weight feeds the MXU; the
        # per-attribute inverse norms (precomputed in JAX) scale the output columns.
        logits = jnp.dot(feat_n, w_ref[...], preferred_element_type=jnp.float32)
        logits_ref[...] = logits * winv_ref[...]


def norm_classifier_forward(feature_nchw, logits_weight):
    """feature_nchw: (B, C, H, W); logits_weight: (nattr, C).

    Returns ([logits], feat_n) matching the PyTorch module (pool='avg' path).
    """
    B, C, H, W = feature_nchw.shape
    nattr, c_in = logits_weight.shape
    assert c_in == C
    HW = H * W

    # Metadata-only reshape: no transpose pass over HBM.
    feat = jnp.reshape(feature_nchw, (B, C, HW))
    itemsize = jnp.dtype(feat.dtype).itemsize

    # Classifier weight plumbing (tiny, static per call, done once in plain JAX):
    #   w_t   : (C, nattr_pad) pre-transposed + zero lane-padded -> lane-dense MXU input
    #   w_inv : (1, nattr_pad) per-attribute 1/max(||w||, eps), applied post-matmul
    w = logits_weight.astype(jnp.float32)
    nattr_pad = _round_up(nattr, 128)
    w_t = jnp.transpose(w)
    w_inv = jax.lax.rsqrt(jnp.maximum(jnp.sum(w * w, axis=1), jnp.float32(EPS * EPS)))
    if nattr_pad != nattr:
        w_t = jnp.pad(w_t, ((0, 0), (0, nattr_pad - nattr)))
        w_inv = jnp.pad(w_inv, (0, nattr_pad - nattr))
    w_inv = jnp.reshape(w_inv, (1, nattr_pad))

    # ---- generation-aware budgets ----
    try:
        vmem_cap = int(getattr(pltpu.get_tpu_info(), "vmem_capacity_bytes",
                               64 * 1024 * 1024))
    except Exception:
        vmem_cap = 64 * 1024 * 1024
    if vmem_cap >= 96 * 1024 * 1024:       # v5e / v6e: 128 MiB VMEM parts
        target_block = 14 * 1024 * 1024
    else:                                   # v7x: 64 MiB per TensorCore
        target_block = 6 * 1024 * 1024
    vmem_limit_cap = (vmem_cap * 3) // 4

    # ---- tile selection (budget-honoring) ----
    lane_min = HW if HW < 128 else 128
    if B <= 8:
        TB = B
    else:
        tb = min(B, 256, max(8, target_block // max(1, C * lane_min * itemsize)))
        tb = min(tb, _round_up(pl.cdiv(B, 2), 8))  # >=2 batch tiles -> both v7x TCs busy
        tb = max(8, (tb // 8) * 8)                 # (8,128): output batch dim % 8
        TB = B if tb >= B else tb

    if TB * C * HW * itemsize <= target_block or HW <= 128:
        THW = HW                                   # full-extent spatial block
    else:
        thw = (target_block // max(1, TB * C * itemsize)) // 128 * 128
        THW = max(128, min(thw, (HW // 128) * 128))

    n_b = pl.cdiv(B, TB)
    n_hw = pl.cdiv(HW, THW)
    ragged_hw = (HW % THW) != 0
    acc_lanes = 128 if THW % 128 == 0 else THW
    n_groups = THW // acc_lanes

    kernel = functools.partial(
        _norm_classifier_kernel, hw_total=HW, thw=THW, acc_lanes=acc_lanes,
        n_groups=n_groups, n_hw=n_hw, ragged_hw=ragged_hw)

    cost = pl.CostEstimate(
        flops=int(B * HW * C + 2 * B * C * nattr_pad + 5 * B * C),
        transcendentals=int(B),
        bytes_accessed=int(B * HW * C * itemsize + C * nattr_pad * 4
                           + B * nattr_pad * 4 + B * C * 4),
    )

    def build(single_buffer_weights):
        w_mode = {}
        if single_buffer_weights:
            # Constant-index resident inputs: one VMEM buffer is enough.
            w_mode = dict(pipeline_mode=pl.Buffered(1))
        w_bufs = 1 if single_buffer_weights else 2

        feat_block = TB * C * THW * itemsize
        vmem_needed = (2 * feat_block
                       + w_bufs * (C * nattr_pad + 8 * nattr_pad) * 4
                       + 2 * (TB * nattr_pad + TB * C) * 4
                       + TB * C * acc_lanes * 4)
        vmem_limit = min(vmem_limit_cap,
                         max(vmem_needed * 5 // 4 + 2 * 1024 * 1024,
                             16 * 1024 * 1024))
        assert vmem_needed <= vmem_limit, (
            f"tile selection exceeds VMEM budget: need {vmem_needed} > {vmem_limit}")

        return pl.pallas_call(
            kernel,
            out_shape=(
                jax.ShapeDtypeStruct((B, nattr_pad), jnp.float32),
                jax.ShapeDtypeStruct((B, C), jnp.float32),
            ),
            grid_spec=pltpu.PrefetchScalarGridSpec(
                num_scalar_prefetch=0,
                grid=(n_b, n_hw),
                in_specs=[
                    pl.BlockSpec((TB, C, THW), lambda b, h: (b, 0, h)),      # feature
                    pl.BlockSpec((C, nattr_pad), lambda b, h: (0, 0), **w_mode),  # W^T
                    pl.BlockSpec((1, nattr_pad), lambda b, h: (0, 0), **w_mode),  # 1/||w||
                ],
                out_specs=(
                    pl.BlockSpec((TB, nattr_pad), lambda b, h: (b, 0)),      # logits
                    pl.BlockSpec((TB, C), lambda b, h: (b, 0)),              # feat_n
                ),
                scratch_shapes=[pltpu.VMEM((TB, C, acc_lanes), jnp.float32)],
            ),
            compiler_params=pltpu.CompilerParams(
                dimension_semantics=("parallel", "arbitrary"),
                vmem_limit_bytes=int(vmem_limit),
            ),
            cost_estimate=cost,
        )

    try:
        logits_pad, feat_n = build(True)(feat, w_t, w_inv)
    except Exception:
        # pipeline_mode=pl.Buffered(1) not supported here -> default double buffering.
        logits_pad, feat_n = build(False)(feat, w_t, w_inv)

    logits = logits_pad[:, :nattr]          # drop lane padding (zero columns)
    # Matches PyTorch: return ([x], feat_n)
    return [logits], feat_n


def init_norm_classifier_params(key, nattr, c_in):
    # PyTorch: self.logits.data.uniform_(-stdv, stdv), stdv = 1/sqrt(c_in)
    stdv = 1.0 / math.sqrt(c_in)
    return jax.random.uniform(key, (nattr, c_in), dtype=jnp.float32,
                              minval=-stdv, maxval=stdv)


if __name__ == "__main__":
    key = jax.random.PRNGKey(0)
    k_feat, k_w = jax.random.split(key)

    # Small shapes consistent with the module: batch=2, c_in=32, spatial=16x16, nattr=8
    B, C, H, W = 2, 32, 16, 16
    nattr = 8

    feature = jax.random.normal(k_feat, (B, C, H, W), dtype=jnp.float32)
    logits_weight = init_norm_classifier_params(k_w, nattr, C)

    logits_list, feat_n = norm_classifier_forward(feature, logits_weight)
    logits = logits_list[0]
    jax.block_until_ready((logits, feat_n))

    # Pure-JAX reference matching the PyTorch module.
    pooled_ref = jnp.mean(feature.reshape(B, C, H * W), axis=-1)
    feat_n_ref = pooled_ref / jnp.maximum(
        jnp.linalg.norm(pooled_ref, axis=1, keepdims=True), EPS)
    w_n_ref = logits_weight / jnp.maximum(
        jnp.linalg.norm(logits_weight, axis=1, keepdims=True), EPS)
    logits_ref = feat_n_ref @ w_n_ref.T

    assert logits.shape == (B, nattr) and feat_n.shape == (B, C)
    assert jnp.allclose(logits, logits_ref, atol=1e-5, rtol=1e-5)
    assert jnp.allclose(feat_n, feat_n_ref, atol=1e-5, rtol=1e-5)

    print("KERNEL_OK")
</pallas_src>

<mosaic_0001>
module attributes {stable_mosaic.version = 11 : i64} {
  func.func @_norm_classifier_kernel(%arg0: i32, %arg1: i32, %arg2: memref<2x32x256xf32, #tpu.memory_space<vmem>>, %arg3: memref<32x128xf32, #tpu.memory_space<vmem>>, %arg4: memref<1x128xf32, #tpu.memory_space<vmem>>, %arg5: memref<2x128xf32, #tpu.memory_space<vmem>>, %arg6: memref<2x32xf32, #tpu.memory_space<vmem>>, %arg7: memref<2x32x128xf32, #tpu.memory_space<vmem>>) attributes {dimension_semantics = [#tpu.dimension_semantics<parallel>, #tpu.dimension_semantics<arbitrary>], iteration_bounds = array<i64: 1, 1>, scalar_prefetch = 0 : i64, scratch_operands = 1 : i64, tpu.core_type = #tpu.core_type<tc>, window_params = [{transform_indices = @transform_0, window_bounds = array<i64: 2, 32, 256>}, {pipeline_mode = #tpu.pipeline_mode<synchronous>, transform_indices = @transform_1, window_bounds = array<i64: 32, 128>}, {pipeline_mode = #tpu.pipeline_mode<synchronous>, transform_indices = @transform_2, window_bounds = array<i64: 1, 128>}, {transform_indices = @transform_3, window_bounds = array<i64: 2, 128>}, {transform_indices = @transform_4, window_bounds = array<i64: 2, 32>}]} {
    %c0 = arith.constant 0 : index
    %c0_0 = arith.constant 0 : index
    %c0_1 = arith.constant 0 : index
    %0 = vector.load %arg2[%c0, %c0_0, %c0_1] : memref<2x32x256xf32, #tpu.memory_space<vmem>>, vector<2x32x256xf32>
    %1 = vector.extract_strided_slice %0 {offsets = [0, 0, 0], sizes = [2, 32, 128], strides = [1, 1, 1]} : vector<2x32x256xf32> to vector<2x32x128xf32>
    %2 = vector.extract_strided_slice %0 {offsets = [0, 0, 128], sizes = [2, 32, 128], strides = [1, 1, 1]} : vector<2x32x256xf32> to vector<2x32x128xf32>
    %3 = arith.addf %1, %2 : vector<2x32x128xf32>
    %c0_i32 = arith.constant 0 : i32
    %4 = arith.cmpi eq, %arg1, %c0_i32 : i32
    %5 = arith.extui %4 : i1 to i32
    %c0_i32_2 = arith.constant 0 : i32
    %6 = arith.cmpi ne, %5, %c0_i32_2 : i32
    scf.if %6 {
      %c0_7 = arith.constant 0 : index
      %c0_8 = arith.constant 0 : index
      %c0_9 = arith.constant 0 : index
      %13 = vector.load %arg7[%c0_7, %c0_8, %c0_9] : memref<2x32x128xf32, #tpu.memory_space<vmem>>, vector<2x32x128xf32>
      tpu.vector_store %arg7[%c0_7, %c0_8, %c0_9], %3 {strides = array<i32>} : memref<2x32x128xf32, #tpu.memory_space<vmem>>, vector<2x32x128xf32>,
    } else {
    }
    %c0_i32_3 = arith.constant 0 : i32
    %7 = arith.cmpi ne, %arg1, %c0_i32_3 : i32
    %8 = arith.extui %7 : i1 to i32
    %c0_i32_4 = arith.constant 0 : i32
    %9 = arith.cmpi ne, %8, %c0_i32_4 : i32
    scf.if %9 {
      %c0_7 = arith.constant 0 : index
      %c0_8 = arith.constant 0 : index
      %c0_9 = arith.constant 0 : index
      %13 = vector.load %arg7[%c0_7, %c0_8, %c0_9] : memref<2x32x128xf32, #tpu.memory_space<vmem>>, vector<2x32x128xf32>
      %14 = arith.addf %13, %3 : vector<2x32x128xf32>
      %c0_10 = arith.constant 0 : index
      %c0_11 = arith.constant 0 : index
      %c0_12 = arith.constant 0 : index
      %15 = vector.load %arg7[%c0_10, %c0_11, %c0_12] : memref<2x32x128xf32, #tpu.memory_space<vmem>>, vector<2x32x128xf32>
      tpu.vector_store %arg7[%c0_10, %c0_11, %c0_12], %14 {strides = array<i32>} : memref<2x32x128xf32, #tpu.memory_space<vmem>>, vector<2x32x128xf32>,
    } else {
    }
    %c0_i32_5 = arith.constant 0 : i32
    %10 = arith.cmpi eq, %arg1, %c0_i32_5 : i32
    %11 = arith.extui %10 : i1 to i32
    %c0_i32_6 = arith.constant 0 : i32
    %12 = arith.cmpi ne, %11, %c0_i32_6 : i32
    scf.if %12 {
      %c0_7 = arith.constant 0 : index
      %c0_8 = arith.constant 0 : index
      %c0_9 = arith.constant 0 : index
      %13 = vector.load %arg7[%c0_7, %c0_8, %c0_9] : memref<2x32x128xf32, #tpu.memory_space<vmem>>, vector<2x32x128xf32>
      %cst = arith.constant dense<0.000000e+00> : vector<2x32xf32>
      %14 = vector.multi_reduction <add>, %13, %cst [2] : vector<2x32x128xf32> to vector<2x32xf32>
      %cst_10 = arith.constant 3.906250e-03 : f32
      %15 = vector.broadcast %cst_10 : f32 to vector<2x32xf32>
      %16 = arith.mulf %14, %15 : vector<2x32xf32>
      %17 = arith.mulf %16, %16 : vector<2x32xf32>
      %cst_11 = arith.constant dense<0.000000e+00> : vector<2xf32>
      %18 = vector.multi_reduction <add>, %17, %cst_11 [1] : vector<2x32xf32> to vector<2xf32>
      %19 = vector.shape_cast %18 : vector<2xf32> to vector<2x1xf32>
      %cst_12 = arith.constant 1.000000e-24 : f32
      %20 = vector.broadcast %cst_12 : f32 to vector<2x1xf32>
      %21 = arith.maximumf %19, %20 : vector<2x1xf32>
      %22 = math.rsqrt %21 : vector<2x1xf32>
      %23 = vector.broadcast %22 : vector<2x1xf32> to vector<2x32xf32>
      %24 = arith.mulf %16, %23 : vector<2x32xf32>
      %c0_13 = arith.constant 0 : index
      %c0_14 = arith.constant 0 : index
      %25 = vector.load %arg6[%c0_13, %c0_14] : memref<2x32xf32, #tpu.memory_space<vmem>>, vector<2x32xf32>
      tpu.vector_store %arg6[%c0_13, %c0_14], %24 {strides = array<i32>} : memref<2x32xf32, #tpu.memory_space<vmem>>, vector<2x32xf32>,
      %c0_15 = arith.constant 0 : index
      %c0_16 = arith.constant 0 : index
      %26 = vector.load %arg3[%c0_15, %c0_16] : memref<32x128xf32, #tpu.memory_space<vmem>>, vector<32x128xf32>
      %cst_17 = arith.constant dense<0.000000e+00> : vector<2x128xf32>
      %27 = tpu.matmul %24, %26, %cst_17 {dimension_numbers = #tpu.dot_dimension_numbers<[1], [0], [0], [1], [0, 0, 1, 1], [], []>} : vector<2x32xf32>, vector<32x128xf32>, vector<2x128xf32> -> vector<2x128xf32>
      %c0_18 = arith.constant 0 : index
      %c0_19 = arith.constant 0 : index
      %28 = vector.load %arg4[%c0_18, %c0_19] : memref<1x128xf32, #tpu.memory_space<vmem>>, vector<1x128xf32>
      %29 = vector.broadcast %28 : vector<1x128xf32> to vector<2x128xf32>
      %30 = arith.mulf %27, %29 : vector<2x128xf32>
      %c0_20 = arith.constant 0 : index
      %c0_21 = arith.constant 0 : index
      %31 = vector.load %arg5[%c0_20, %c0_21] : memref<2x128xf32, #tpu.memory_space<vmem>>, vector<2x128xf32>
      tpu.vector_store %arg5[%c0_20, %c0_21], %30 {strides = array<i32>} : memref<2x128xf32, #tpu.memory_space<vmem>>, vector<2x128xf32>,
    } else {
    }
    return
  }
  func.func @transform_0(%arg0: i32, %arg1: i32) -> (i32, i32, i32) {
    %c0_i32 = arith.constant 0 : i32
    %c0_i32_0 = arith.constant 0 : i32
    return %arg0, %c0_i32, %arg1 : i32, i32, i32
  }
  func.func @transform_1(%arg0: i32, %arg1: i32) -> (i32, i32) {
    %c0_i32 = arith.constant 0 : i32
    %c0_i32_0 = arith.constant 0 : i32
    %c0_i32_1 = arith.constant 0 : i32
    return %c0_i32, %c0_i32_0 : i32, i32
  }
  func.func @transform_2(%arg0: i32, %arg1: i32) -> (i32, i32) {
    %c0_i32 = arith.constant 0 : i32
    %c0_i32_0 = arith.constant 0 : i32
    %c0_i32_1 = arith.constant 0 : i32
    return %c0_i32, %c0_i32_0 : i32, i32
  }
  func.func @transform_3(%arg0: i32, %arg1: i32) -> (i32, i32) {
    %c0_i32 = arith.constant 0 : i32
    %c0_i32_0 = arith.constant 0 : i32
    return %arg0, %c0_i32 : i32, i32
  }
  func.func @transform_4(%arg0: i32, %arg1: i32) -> (i32, i32) {
    %c0_i32 = arith.constant 0 : i32
    %c0_i32_0 = arith.constant 0 : i32
    return %arg0, %c0_i32 : i32, i32
  }
}

module attributes {stable_mosaic.version = 11 : i64} {
  func.func @_norm_classifier_kernel(%arg0: i32, %arg1: i32, %arg2: memref<2x32x256xf32, #tpu.memory_space<vmem>>, %arg3: memref<32x128xf32, #tpu.memory_space<vmem>>, %arg4: memref<1x128xf32, #tpu.memory_space<vmem>>, %arg5: memref<2x128xf32, #tpu.memory_space<vmem>>, %arg6: memref<2x32xf32, #tpu.memory_space<vmem>>, %arg7: memref<2x32x128xf32, #tpu.memory_space<vmem>>) attributes {dimension_semantics = [#tpu.dimension_semantics<parallel>, #tpu.dimension_semantics<arbitrary>], iteration_bounds = array<i64: 1, 1>, scalar_prefetch = 0 : i64, scratch_operands = 1 : i64, tpu.core_type = #tpu.core_type<tc>, window_params = [{transform_indices = @transform_0, window_bounds = array<i64: 2, 32, 256>}, {pipeline_mode = #tpu.pipeline_mode<synchronous>, transform_indices = @transform_1, window_bounds = array<i64: 32, 128>}, {pipeline_mode = #tpu.pipeline_mode<synchronous>, transform_indices = @transform_2, window_bounds = array<i64: 1, 128>}, {transform_indices = @transform_3, window_bounds = array<i64: 2, 128>}, {transform_indices = @transform_4, window_bounds = array<i64: 2, 32>}]} {
    %c0 = arith.constant 0 : index
    %c0_0 = arith.constant 0 : index
    %c0_1 = arith.constant 0 : index
    %0 = vector.load %arg2[%c0, %c0_0, %c0_1] : memref<2x32x256xf32, #tpu.memory_space<vmem>>, vector<2x32x256xf32>
    %1 = vector.extract_strided_slice %0 {offsets = [0, 0, 0], sizes = [2, 32, 128], strides = [1, 1, 1]} : vector<2x32x256xf32> to vector<2x32x128xf32>
    %2 = vector.extract_strided_slice %0 {offsets = [0, 0, 128], sizes = [2, 32, 128], strides = [1, 1, 1]} : vector<2x32x256xf32> to vector<2x32x128xf32>
    %3 = arith.addf %1, %2 : vector<2x32x128xf32>
    %c0_i32 = arith.constant 0 : i32
    %4 = arith.cmpi eq, %arg1, %c0_i32 : i32
    %5 = arith.extui %4 : i1 to i32
    %c0_i32_2 = arith.constant 0 : i32
    %6 = arith.cmpi ne, %5, %c0_i32_2 : i32
    scf.if %6 {
      %c0_7 = arith.constant 0 : index
      %c0_8 = arith.constant 0 : index
      %c0_9 = arith.constant 0 : index
      %13 = vector.load %arg7[%c0_7, %c0_8, %c0_9] : memref<2x32x128xf32, #tpu.memory_space<vmem>>, vector<2x32x128xf32>
      tpu.vector_store %arg7[%c0_7, %c0_8, %c0_9], %3 {strides = array<i32>} : memref<2x32x128xf32, #tpu.memory_space<vmem>>, vector<2x32x128xf32>,
    } else {
    }
    %c0_i32_3 = arith.constant 0 : i32
    %7 = arith.cmpi ne, %arg1, %c0_i32_3 : i32
    %8 = arith.extui %7 : i1 to i32
    %c0_i32_4 = arith.constant 0 : i32
    %9 = arith.cmpi ne, %8, %c0_i32_4 : i32
    scf.if %9 {
      %c0_7 = arith.constant 0 : index
      %c0_8 = arith.constant 0 : index
      %c0_9 = arith.constant 0 : index
      %13 = vector.load %arg7[%c0_7, %c0_8, %c0_9] : memref<2x32x128xf32, #tpu.memory_space<vmem>>, vector<2x32x128xf32>
      %14 = arith.addf %13, %3 : vector<2x32x128xf32>
      %c0_10 = arith.constant 0 : index
      %c0_11 = arith.constant 0 : index
      %c0_12 = arith.constant 0 : index
      %15 = vector.load %arg7[%c0_10, %c0_11, %c0_12] : memref<2x32x128xf32, #tpu.memory_space<vmem>>, vector<2x32x128xf32>
      tpu.vector_store %arg7[%c0_10, %c0_11, %c0_12], %14 {strides = array<i32>} : memref<2x32x128xf32, #tpu.memory_space<vmem>>, vector<2x32x128xf32>,
    } else {
    }
    %c0_i32_5 = arith.constant 0 : i32
    %10 = arith.cmpi eq, %arg1, %c0_i32_5 : i32
    %11 = arith.extui %10 : i1 to i32
    %c0_i32_6 = arith.constant 0 : i32
    %12 = arith.cmpi ne, %11, %c0_i32_6 : i32
    scf.if %12 {
      %c0_7 = arith.constant 0 : index
      %c0_8 = arith.constant 0 : index
      %c0_9 = arith.constant 0 : index
      %13 = vector.load %arg7[%c0_7, %c0_8, %c0_9] : memref<2x32x128xf32, #tpu.memory_space<vmem>>, vector<2x32x128xf32>
      %cst = arith.constant dense<0.000000e+00> : vector<2x32xf32>
      %14 = vector.multi_reduction <add>, %13, %cst [2] : vector<2x32x128xf32> to vector<2x32xf32>
      %cst_10 = arith.constant 3.906250e-03 : f32
      %15 = vector.broadcast %cst_10 : f32 to vector<2x32xf32>
      %16 = arith.mulf %14, %15 : vector<2x32xf32>
      %17 = arith.mulf %16, %16 : vector<2x32xf32>
      %cst_11 = arith.constant dense<0.000000e+00> : vector<2xf32>
      %18 = vector.multi_reduction <add>, %17, %cst_11 [1] : vector<2x32xf32> to vector<2xf32>
      %19 = vector.shape_cast %18 : vector<2xf32> to vector<2x1xf32>
      %cst_12 = arith.constant 1.000000e-24 : f32
      %20 = vector.broadcast %cst_12 : f32 to vector<2x1xf32>
      %21 = arith.maximumf %19, %20 : vector<2x1xf32>
      %22 = math.rsqrt %21 : vector<2x1xf32>
      %23 = vector.broadcast %22 : vector<2x1xf32> to vector<2x32xf32>
      %24 = arith.mulf %16, %23 : vector<2x32xf32>
      %c0_13 = arith.constant 0 : index
      %c0_14 = arith.constant 0 : index
      %25 = vector.load %arg6[%c0_13, %c0_14] : memref<2x32xf32, #tpu.memory_space<vmem>>, vector<2x32xf32>
      tpu.vector_store %arg6[%c0_13, %c0_14], %24 {strides = array<i32>} : memref<2x32xf32, #tpu.memory_space<vmem>>, vector<2x32xf32>,
      %c0_15 = arith.constant 0 : index
      %c0_16 = arith.constant 0 : index
      %26 = vector.load %arg3[%c0_15, %c0_16] : memref<32x128xf32, #tpu.memory_space<vmem>>, vector<32x128xf32>
      %cst_17 = arith.constant dense<0.000000e+00> : vector<2x128xf32>
      %27 = tpu.matmul %24, %26, %cst_17 {dimension_numbers = #tpu.dot_dimension_numbers<[1], [0], [0], [1], [0, 0, 1, 1], [], []>} : vector<2x32xf32>, vector<32x128xf32>, vector<2x128xf32> -> vector<2x128xf32>
      %c0_18 = arith.constant 0 : index
      %c0_19 = arith.constant 0 : index
      %28 = vector.load %arg4[%c0_18, %c0_19] : memref<1x128xf32, #tpu.memory_space<vmem>>, vector<1x128xf32>
      %29 = vector.broadcast %28 : vector<1x128xf32> to vector<2x128xf32>
      %30 = arith.mulf %27, %29 : vector<2x128xf32>
      %c0_20 = arith.constant 0 : index
      %c0_21 = arith.constant 0 : index
      %31 = vector.load %arg5[%c0_20, %c0_21] : memref<2x128xf32, #tpu.memory_space<vmem>>, vector<2x128xf32>
      tpu.vector_store %arg5[%c0_20, %c0_21], %30 {strides = array<i32>} : memref<2x128xf32, #tpu.memory_space<vmem>>, vector<2x128xf32>,
    } else {
    }
    return
  }
  func.func @transform_0(%arg0: i32, %arg1: i32) -> (i32, i32, i32) {
    %c0_i32 = arith.constant 0 : i32
    %c0_i32_0 = arith.constant 0 : i32
    return %arg0, %c0_i32, %arg1 : i32, i32, i32
  }
  func.func @transform_1(%arg0: i32, %arg1: i32) -> (i32, i32) {
    %c0_i32 = arith.constant 0 : i32
    %c0_i32_0 = arith.constant 0 : i32
    %c0_i32_1 = arith.constant 0 : i32
    return %c0_i32, %c0_i32_0 : i32, i32
  }
  func.func @transform_2(%arg0: i32, %arg1: i32) -> (i32, i32) {
    %c0_i32 = arith.constant 0 : i32
    %c0_i32_0 = arith.constant 0 : i32
    %c0_i32_1 = arith.constant 0 : i32
    return %c0_i32, %c0_i32_0 : i32, i32
  }
  func.func @transform_3(%arg0: i32, %arg1: i32) -> (i32, i32) {
    %c0_i32 = arith.constant 0 : i32
    %c0_i32_0 = arith.constant 0 : i32
    return %arg0, %c0_i32 : i32, i32
  }
  func.func @transform_4(%arg0: i32, %arg1: i32) -> (i32, i32) {
    %c0_i32 = arith.constant 0 : i32
    %c0_i32_0 = arith.constant 0 : i32
    return %arg0, %c0_i32 : i32, i32
  }
}

</mosaic_0001>

<bundles_post_ra>
// kernel: tpu_custom_call.1
= control target key start
LH: loop header
LB: loop body
LE: loop exit
PB: predicated region body
PF: predicated region fallthrough
CT: control target
= control target key end

     0   :  { %10 = vsyncpa [#allocation4], 0  ;;  %s693_s0 = inlined_call_operand.hbm [shape: f32[2,32,256], index: 0, kind: input, shape index: {}]   ;;  %s694_s1 = inlined_call_operand.hbm [shape: f32[32,128], index: 1, kind: input, shape index: {}]   ;;  %s695_s2 = inlined_call_operand.vmem [shape: f32[1,128], index: 2, kind: input, shape index: {}]   ;;  %s696_s3 = inlined_call_operand.hbm [shape: f32[2,128], index: 3, kind: output, shape index: {0}]   ;;  %s697_s4 = inlined_call_operand.hbm [shape: f32[2,32], index: 4, kind: output, shape index: {1}]  }
   0x1   :  { %11 = vsyncpa [#allocation7], 0 }
   0x2   :  { %12 = vsyncpa [#allocation5], 0 }
   0x3   :  { %13 = vsyncpa [#allocation10], 0  ;;  %s560_s15 = smov [#allocation3]   ;;  %s464_s19 = scalar_lea.hbm %s693_s0, 2048 }
   0x4   :  { %s19_s16 = sshll.u32 %s560_s15, 4  ;;  %p465_p0 = scmp.ne.s32.totalorder %s693_s0, %s464_s19  ;;  %s20_s16 = int_to_ptr.vmem [resolvable:$true] %s19_s16 }
   0x5   :  { %p468_p1 = scmp.lt.u32.totalorder %s464_s19, %s693_s0 }
   0x7   :  { %p470_p2 = pnand %p468_p1, %p465_p0 }
   0x9   :  { %473 = shalt.err (!%p470_p2)
}
   0xa   :  { %s474_s24 = scalar_lea.vmem %s20_s16, 2048  ;;  %p479_p4 = scmp.lt.s32.totalorder %s20_s16, %s20_s16 }
   0xb   :  { %p475_p3 = scmp.ne.s32.totalorder %s20_s16, %s474_s24  ;;  %p480_p5 = scmp.lt.s32.totalorder %s474_s24, %s474_s24 }
   0xd   :  { %p481_p6 = por %p480_p5, %p479_p4 }
   0xf   :  { %p482_p7 = pnand %p481_p6, %p475_p3 }
  0x11   :  { %485 = shalt.err (!%p482_p7)
}
  0x12   :  { %s561_s25 = smov 256   ;;  %s562_s26 = smov 16  }
  0x13   :  { %25 = dma.hbm_to_vmem [thread:$0]  %s693_s0, 2048, %s20_s16, [#allocation4], %s561_s25, %s561_s25, %s562_s26  }
  0x14   :  { %s563_s29 = smov [#allocation6]   ;;  %s486_s7 = scalar_lea.hbm %s694_s1, 512 }
  0x15   :  { %s31_s30 = sshll.u32 %s563_s29, 4  ;;  %p487_p8 = scmp.ne.s32.totalorder %s694_s1, %s486_s7  ;;  %s32_s30 = int_to_ptr.vmem [resolvable:$true] %s31_s30 }
  0x16   :  { %p490_p9 = scmp.lt.u32.totalorder %s486_s7, %s694_s1 }
  0x18   :  { %p492_p10 = pnand %p490_p9, %p487_p8 }
  0x1a   :  { %495 = shalt.err (!%p492_p10)
}
  0x1b   :  { %s496_s12 = scalar_lea.vmem %s32_s30, 512  ;;  %p501_p12 = scmp.lt.s32.totalorder %s32_s30, %s32_s30 }
  0x1c   :  { %p497_p11 = scmp.ne.s32.totalorder %s32_s30, %s496_s12  ;;  %p502_p13 = scmp.lt.s32.totalorder %s496_s12, %s496_s12 }
  0x1e   :  { %p503_p0 = por %p502_p13, %p501_p12 }
  0x20   :  { %p504_p1 = pnand %p503_p0, %p497_p11 }
  0x22   :  { %507 = shalt.err (!%p504_p1)
}
  0x23   :  { %s564_s0 = smov 128   ;;  %s565_s13 = smov 8  }
  0x24   :  { %37 = dma.hbm_to_vmem [thread:$0]  %s694_s1, 512, %s32_s30, [#allocation7], %s564_s0, %s564_s0, %s565_s13  }
  0x25   :  { %552 = dma.done.wait [#allocation4], 2048  }
  0x26   :  { %553 = vsyncadd [#allocation4], 4294965248 }
  0x27   :  { %554 = dma.done.wait [#allocation7], 512  }
  0x28   :  { %555 = vsyncadd [#allocation7], 4294966784  ;;  %v54_v0 = vld [vmem:[#allocation3 + $0x40] sm:$0xff]  ;;  %v55_v1 = vld [vmem:[#allocation3 + $0x48] sm:$0xff]  ;;  %v161_v24 = vlaneseq  ;;  %vm172_vm0 = vcmask 130112   ;;  %vm179_vm1 = vcmask 195712  }
  0x29   :  { %v46_v2 = vld [vmem:[#allocation3] sm:$0xff]  ;;  %v66_v3 = vadd.f32 %v55_v1, %v54_v0  ;;  %v47_v4 = vld [vmem:[#allocation3 + $0x8] sm:$0xff]  ;;  %v56_v5 = vld [vmem:[#allocation3 + $0x50] sm:$0xff]  ;;  %vm186_vm2 = vcmask 261312   ;;  %vm207_vm3 = vcmask 1041409   ;;  %vm210_vm4 = vcmask 254976  }
  0x2a   :  { %v57_v6 = vld [vmem:[#allocation3 + $0x58] sm:$0xff]  ;;  %v62_v7 = vadd.f32 %v47_v4, %v46_v2  ;;  %v48_v8 = vld [vmem:[#allocation3 + $0x10] sm:$0xff]  ;;  %v58_v12 = vld [vmem:[#allocation3 + $0x60] sm:$0xff]  ;;  %v162_v27 = vand.u32 127, %v161_v24  ;;  %v164_v34 = vshrl.u32 %v161_v24, 7  ;;  %vm568_vm5 = vmmov 0  }
  0x2b   :  { %v49_v9 = vld [vmem:[#allocation3 + $0x18] sm:$0xff]  ;;  %129 = vadd.xlane.f32.xlu1 %v66_v3  ;;  %v67_v10 = vadd.f32 %v57_v6, %v56_v5  ;;  %v59_v13 = vld [vmem:[#allocation3 + $0x68] sm:$0xff]  ;;  %v50_v14 = vld [vmem:[#allocation3 + $0x20] sm:$0xff]  ;;  %vm312_vm6 = vcmask 261120   ;;  %s570_s1 = smov [#allocation9]  }
  0x2c   :  { %121 = vadd.xlane.f32.xlu0 %v62_v7  ;;  %v63_v11 = vadd.f32 %v49_v9, %v48_v8  ;;  %v51_v15 = vld [vmem:[#allocation3 + $0x28] sm:$0xff]  ;;  %v68_v16 = vadd.f32 %v59_v13, %v58_v12  ;;  %v60_v18 = vld [vmem:[#allocation3 + $0x70] sm:$0xff]  ;;  %v61_v19 = vld [vmem:[#allocation3 + $0x78] sm:$0xff]  ;;  %v167_v29 = vadd.s32 4294967288, %v162_v27  ;;  %v174_v33 = vadd.s32 4294967280, %v162_v27  ;;  %s410_s16 = sshll.u32 %s570_s1, 4  ;;  %s411_s16 = int_to_ptr.vmem [resolvable:$true] %s410_s16 }
  0x2d   :  { %v64_v17 = vadd.f32 %v51_v15, %v50_v14  ;;  %v52_v20 = vld [vmem:[#allocation3 + $0x30] sm:$0xff]  ;;  %v53_v21 = vld [vmem:[#allocation3 + $0x38] sm:$0xff]  ;;  %v69_v22 = vadd.f32 %v61_v19, %v60_v18  ;;  %v181_v42 = vadd.s32 4294967272, %v162_v27  ;;  %v629_v46 = vsub.s32 %v162_v27, %v164_v34  ;;  %s508_s17 = scalar_lea.vmem %s411_s16, 32  ;;  %p513_p3 = scmp.lt.s32.totalorder %s411_s16, %s411_s16 }
  0x2e   :  { %v65_v23 = vadd.f32 %v53_v21, %v52_v20  ;;  %v623_v38 = vsub.s32 %v167_v29, %v164_v34  ;;  %v627_v44 = vsub.s32 %v174_v33, %v164_v34  ;;  %v219_v13 = vsub.s32 0, %v164_v34  ;;  %p509_p2 = scmp.ne.s32.totalorder %s411_s16, %s508_s17  ;;  %p514_p4 = scmp.lt.s32.totalorder %s508_s17, %s508_s17 }
  0x2f   :  { %131 = vadd.xlane.f32.xlu1 %v67_v10  ;;  %v632_v53 = vsub.s32 %v181_v42, %v164_v34  ;;  %v566_v10 = vmov 0   ;;  %v223_v14 = vsub.s32 1, %v164_v34 }
  0x30   :  { %123 = vadd.xlane.f32.xlu0 %v63_v11  ;;  %460 = vset.pattern.permute.xlu1 %v566_v10  ;;  %p515_p5 = por %p514_p4, %p513_p3 }
  0x31   :  { %461 = vset.pattern.permute.xlu0 %v566_v10 }
  0x32   :  { %p516_p6 = pnand %p515_p5, %p509_p2 }
  0x33   :  { %133 = vadd.xlane.f32.xlu1 %v68_v16 }
  0x34   :  { %125 = vadd.xlane.f32.xlu0 %v64_v17 }
  0x37   :  { %135 = vadd.xlane.f32.xlu1 %v69_v22 }
  0x38   :  { %127 = vadd.xlane.f32.xlu0 %v65_v23 }
  0xb8   :  { %v130_v25 = vpop.xlane.xlu1 %129 }
  0xb9   :  { %v122_v26 = vpop.xlane.xlu0 %121  ;;  %v141_v35 = vmul.f32 0.00390625, %v130_v25  ;;  %v308_v25 = vld [vmem:[#allocation6] sm:$0xff] }
  0xba   :  { %v137_v36 = vmul.f32 0.00390625, %v122_v26  ;;  %v309_v26 = vld [vmem:[#allocation6 + $0x8] sm:$0xff] }
  0xbb   :  { %v149_v47 = vmul.f32 %v141_v35, %v141_v35  ;;  %v443_v27 = vpack.c.bf16 %v309_v26, %v308_v25 }
  0xbc   :  { %v132_v28 = vpop.xlane.xlu1 %131  ;;  %v145_v49 = vmul.f32 %v137_v36, %v137_v36 }
  0xbd   :  { %v621_v30 = vmul.f32 0.00390625, %v132_v28  ;;  %v124_v31 = vpop.xlane.xlu0 %123  ;;  %v191_v59 = vrot.slane %v149_v47, %v629_v46  ;;  %v567_v28 = vmov 0.0|0.0  }
  0xbe   :  { %v138_v32 = vmul.f32 0.00390625, %v124_v31  ;;  %v166_v62 = vrot.slane %v145_v49, %v629_v46  ;;  %442 = vmatprep.subr.bf16.mxu0 %v567_v28  ;;  %v310_v31 = vld [vmem:[#allocation6 + $0x10] sm:$0xff] }
  0xbf   :  { %v150_v39 = vmul.f32 %v621_v30, %v621_v30  ;;  %444 = vmatpush3.bf16.msra.mxu0 %v443_v27 }
  0xc0   :  { %v134_v37 = vpop.xlane.xlu1 %133  ;;  %v146_v43 = vmul.f32 %v138_v32, %v138_v32  ;;  %445 = vmatprep.subr.bf16.mxu0 %v567_v28 }
  0xc1   :  { %v143_v40 = vmul.f32 0.00390625, %v134_v37  ;;  %v126_v41 = vpop.xlane.xlu0 %125  ;;  %v195_v52 = vrot.slane %v150_v39, %v623_v38 }
  0xc2   :  { %v139_v45 = vmul.f32 0.00390625, %v126_v41  ;;  %v171_v56 = vrot.slane %v146_v43, %v623_v38 }
  0xc3   :  { %v151_v48 = vmul.f32 %v143_v40, %v143_v40  ;;  %v196_v1 = vsel %vm172_vm0, %v195_v52, %v191_v59 }
  0xc4   :  { %v147_v50 = vmul.f32 %v139_v45, %v139_v45  ;;  %v136_v51 = vpop.xlane.xlu1 %135  ;;  %v173_v3 = vsel %vm172_vm0, %v171_v56, %v166_v62 }
  0xc5   :  { %v144_v54 = vmul.f32 0.00390625, %v136_v51  ;;  %v128_v55 = vpop.xlane.xlu0 %127  ;;  %v200_v57 = vrot.slane %v151_v48, %v627_v44 }
  0xc6   :  { %v140_v58 = vmul.f32 0.00390625, %v128_v55  ;;  %v178_v60 = vrot.slane %v147_v50, %v627_v44 }
  0xc7   :  { %v152_v61 = vmul.f32 %v144_v54, %v144_v54  ;;  %v201_v4 = vsel %vm179_vm1, %v200_v57, %v196_v1 }
  0xc8   :  { %v148_v63 = vmul.f32 %v140_v58, %v140_v58  ;;  %v180_v5 = vsel %vm179_vm1, %v178_v60, %v173_v3 }
  0xc9   :  { %v205_v0 = vrot.slane %v152_v61, %v632_v53 }
  0xca   :  { %v185_v2 = vrot.slane %v148_v63, %v632_v53 }
  0xcb   :  { %v206_v6 = vsel %vm186_vm2, %v205_v0, %v201_v4 }
  0xcc   :  { %v187_v7 = vsel %vm186_vm2, %v185_v2, %v180_v5 }
  0xcd   :  { %v208_v8 = vsel %vm207_vm3, %v206_v6, %v187_v7 }
  0xce   :  { %v211_v9 = vsel %vm210_vm4, %v208_v8, 0.0 }
  0xcf   :  { %212 = vadd.xlane.f32.xlu0 %v211_v9 }
 0x15c   :  { %v213_v11 = vpop.xlane.xlu0 %212 }
 0x15d   :  { %v214_v12 = vmax.f32 %v213_v11, 1e-24 }
 0x15f   :  { %462 = vrsqrt.f32 %v214_v12 }
 0x169   :  { %v463_v15 = vpop.eup %462 }
 0x16a   :  { %v220_v16 = vrot.slane %v463_v15, %v219_v13  ;;  %v224_v19 = vrot.slane %v463_v15, %v223_v14 }
 0x16c   :  { %v228_v17 = vmul.f32 %v220_v16, %v138_v32  ;;  %v227_v18 = vmul.f32 %v220_v16, %v137_v36  ;;  %v231_v20 = vmul.f32 %v224_v19, %v141_v35  ;;  %v232_v21 = vmul.f32 %v224_v19, %v621_v30  ;;  %v311_v32 = vld [vmem:[#allocation6 + $0x18] sm:$0xff] }
 0x16d   :  { %v229_v22 = vmul.f32 %v220_v16, %v139_v45  ;;  %v233_v23 = vmul.f32 %v224_v19, %v143_v40  ;;  %v230_v24 = vmul.f32 %v220_v16, %v140_v58  ;;  %v234_v29 = vmul.f32 %v224_v19, %v144_v54 }
 0x16e   :  { %247 = vperm.xlu0 %461, %v228_v17   ;;  %244 = vperm.xlu1 %460, %v227_v18   ;;  %v446_v33 = vpack.c.bf16 %v311_v32, %v310_v31  ;;  %v569_v30 = vmov 0.0  }
 0x16f   :  { %439 = vmatprep.mubr.msk.f32.mxu0 %vm568_vm5, %v569_v30 }
 0x170   :  { %447 = vmatpush3.bf16.msra.mxu0 %v446_v33 }
 0x172   :  { %256 = vperm.xlu1 %460, %v231_v20  }
 0x176   :  { %259 = vperm.xlu1 %460, %v232_v21  }
 0x17a   :  { %250 = vperm.xlu1 %460, %v229_v22  }
 0x17e   :  { %262 = vperm.xlu1 %460, %v233_v23  }
 0x182   :  { %253 = vperm.xlu1 %460, %v230_v24  }
 0x186   :  { %265 = vperm.xlu1 %460, %v234_v29  }
 0x1ed   :  { %v245_v34 = vpop.permute.xlu1 %244  ;;  %v248_v40 = vpop.permute.xlu0 %247 }
 0x1ee   :  { %v274_v42 = vrot.slane %v248_v40, %v623_v38  ;;  %v270_v43 = vrot.slane %v245_v34, %v629_v46 }
 0x1f0   :  { %v275_v52 = vsel %vm172_vm0, %v274_v42, %v270_v43 }
 0x1f1   :  { %v257_v35 = vpop.permute.xlu1 %256 }
 0x1f2   :  { %v289_v49 = vrot.slane %v257_v35, %v629_v46 }
 0x1f5   :  { %v260_v36 = vpop.permute.xlu1 %259 }
 0x1f6   :  { %v293_v45 = vrot.slane %v260_v36, %v623_v38 }
 0x1f8   :  { %v294_v54 = vsel %vm172_vm0, %v293_v45, %v289_v49 }
 0x1f9   :  { %v251_v37 = vpop.permute.xlu1 %250 }
 0x1fa   :  { %v279_v47 = vrot.slane %v251_v37, %v627_v44 }
 0x1fc   :  { %v280_v56 = vsel %vm179_vm1, %v279_v47, %v275_v52 }
 0x1fd   :  { %v263_v39 = vpop.permute.xlu1 %262 }
 0x1fe   :  { %v298_v48 = vrot.slane %v263_v39, %v627_v44 }
 0x200   :  { %v299_v57 = vsel %vm179_vm1, %v298_v48, %v294_v54 }
 0x201   :  { %v254_v41 = vpop.permute.xlu1 %253 }
 0x202   :  { %v284_v50 = vrot.slane %v254_v41, %v632_v53 }
 0x204   :  { %v285_v38 = vsel %vm186_vm2, %v284_v50, %v280_v56 }
 0x205   :  { %v266_v51 = vpop.permute.xlu1 %265 }
 0x206   :  { %v303_v55 = vrot.slane %v266_v51, %v632_v53 }
 0x208   :  { %v304_v44 = vsel %vm186_vm2, %v303_v55, %v299_v57 }
 0x209   :  { %v305_v46 = vsel %vm207_vm3, %v304_v44, %v285_v38 }
 0x20a   :  { %440 = vmatmul.mubr.msk.f32.vlgmr.msra.gmra.mrb[0].mxu0 %vm312_vm6, %v305_v46  ;;  %307 = vst.msk [vmem:[#allocation9] sm:$0x3] %vm210_vm4, %v305_v46 }
 0x20b   :  { %519 = shalt.err (!%p516_p6)
}
 0x20c   :  { %s520_s20 = scalar_lea.hbm %s697_s4, 32 }
 0x20d   :  { %p521_p7 = scmp.ne.s32.totalorder %s697_s4, %s520_s20  ;;  %p524_p8 = scmp.lt.u32.totalorder %s520_s20, %s697_s4 }
 0x20f   :  { %p526_p9 = pnand %p524_p8, %p521_p7 }
 0x211   :  { %529 = shalt.err (!%p526_p9)
}
 0x212   :  { %413 = dma.vmem_to_hbm [thread:$0]  %s411_s16, 32, %s697_s4, [#allocation10]   ;;  %v425_v53 = vld [vmem:[%s695_s2] ss:$0 sm:$0xff] }
 0x213   :  { %s571_s29 = smov [#allocation8]  }
 0x214   :  { %s400_s30 = sshll.u32 %s571_s29, 4  ;;  %s401_s30 = int_to_ptr.vmem [resolvable:$true] %s400_s30 }
 0x215   :  { %s530_s5 = scalar_lea.vmem %s401_s30, 32  ;;  %p535_p11 = scmp.lt.s32.totalorder %s401_s30, %s401_s30 }
 0x216   :  { %p531_p10 = scmp.ne.s32.totalorder %s401_s30, %s530_s5  ;;  %p536_p12 = scmp.lt.s32.totalorder %s530_s5, %s530_s5 }
 0x218   :  { %p537_p13 = por %p536_p12, %p535_p11 }
 0x21a   :  { %p538_p0 = pnand %p537_p13, %p531_p10 }
 0x2dd   :  { %v381_v58 = vpop.f32.mrb[0].mxu0 }
 0x2de   :  { %v392_v59 = vmul.f32 %v425_v53, %v381_v58  ;;  %v441_v60 = vpop.f32.mrb[1].mxu0 }
 0x2e0   :  { %393 = vst [vmem:[#allocation8] sm:$0x3] %v392_v59 }
 0x2e1   :  { %541 = shalt.err (!%p538_p0)
}
 0x2e2   :  { %s542_s7 = scalar_lea.hbm %s696_s3, 32 }
 0x2e3   :  { %p543_p1 = scmp.ne.s32.totalorder %s696_s3, %s542_s7  ;;  %p546_p2 = scmp.lt.u32.totalorder %s542_s7, %s696_s3 }
 0x2e5   :  { %p548_p3 = pnand %p546_p2, %p543_p1 }
 0x2e7   :  { %551 = shalt.err (!%p548_p3)
}
 0x2e8   :  { %403 = dma.vmem_to_hbm [thread:$0]  %s401_s30, 32, %s696_s3, [#allocation5]  }
 0x2e9   :  { %556 = dma.done.wait [#allocation5], 32  }
 0x2ea   :  { %557 = vsyncadd [#allocation5], 4294967264 }
 0x2eb   :  { %558 = dma.done.wait [#allocation10], 32  }
 0x2ec   :  { %559 = vsyncadd [#allocation10], 4294967264 }
 0x2ed   :  { %420 = vsyncpa [#allocation4], 1 }
 0x2ee   :  { %421 = vsyncpa [#allocation7], 1 }
 0x2ef   :  { %422 = vsyncpa [#allocation5], 1 }
 0x2f0   :  { %423 = vsyncpa [#allocation10], 1 }

// kernel: tpu_custom_call.1
= control target key start
LH: loop header
LB: loop body
LE: loop exit
PB: predicated region body
PF: predicated region fallthrough
CT: control target
= control target key end

     0   :  { %10 = vsyncpa [#allocation4], 0  ;;  %s693_s0 = inlined_call_operand.hbm [shape: f32[2,32,256], index: 0, kind: input, shape index: {}]   ;;  %s694_s1 = inlined_call_operand.hbm [shape: f32[32,128], index: 1, kind: input, shape index: {}]   ;;  %s695_s2 = inlined_call_operand.vmem [shape: f32[1,128], index: 2, kind: input, shape index: {}]   ;;  %s696_s3 = inlined_call_operand.hbm [shape: f32[2,128], index: 3, kind: output, shape index: {0}]   ;;  %s697_s4 = inlined_call_operand.hbm [shape: f32[2,32], index: 4, kind: output, shape index: {1}]  }
   0x1   :  { %11 = vsyncpa [#allocation7], 0 }
   0x2   :  { %12 = vsyncpa [#allocation5], 0 }
   0x3   :  { %13 = vsyncpa [#allocation10], 0  ;;  %s560_s15 = smov [#allocation3]   ;;  %s464_s19 = scalar_lea.hbm %s693_s0, 2048 }
   0x4   :  { %s19_s16 = sshll.u32 %s560_s15, 4  ;;  %p465_p0 = scmp.ne.s32.totalorder %s693_s0, %s464_s19  ;;  %s20_s16 = int_to_ptr.vmem [resolvable:$true] %s19_s16 }
   0x5   :  { %p468_p1 = scmp.lt.u32.totalorder %s464_s19, %s693_s0 }
   0x7   :  { %p470_p2 = pnand %p468_p1, %p465_p0 }
   0x9   :  { %473 = shalt.err (!%p470_p2)
}
   0xa   :  { %s474_s24 = scalar_lea.vmem %s20_s16, 2048  ;;  %p479_p4 = scmp.lt.s32.totalorder %s20_s16, %s20_s16 }
   0xb   :  { %p475_p3 = scmp.ne.s32.totalorder %s20_s16, %s474_s24  ;;  %p480_p5 = scmp.lt.s32.totalorder %s474_s24, %s474_s24 }
   0xd   :  { %p481_p6 = por %p480_p5, %p479_p4 }
   0xf   :  { %p482_p7 = pnand %p481_p6, %p475_p3 }
  0x11   :  { %485 = shalt.err (!%p482_p7)
}
  0x12   :  { %s561_s25 = smov 256   ;;  %s562_s26 = smov 16  }
  0x13   :  { %25 = dma.hbm_to_vmem [thread:$0]  %s693_s0, 2048, %s20_s16, [#allocation4], %s561_s25, %s561_s25, %s562_s26  }
  0x14   :  { %s563_s29 = smov [#allocation6]   ;;  %s486_s7 = scalar_lea.hbm %s694_s1, 512 }
  0x15   :  { %s31_s30 = sshll.u32 %s563_s29, 4  ;;  %p487_p8 = scmp.ne.s32.totalorder %s694_s1, %s486_s7  ;;  %s32_s30 = int_to_ptr.vmem [resolvable:$true] %s31_s30 }
  0x16   :  { %p490_p9 = scmp.lt.u32.totalorder %s486_s7, %s694_s1 }
  0x18   :  { %p492_p10 = pnand %p490_p9, %p487_p8 }
  0x1a   :  { %495 = shalt.err (!%p492_p10)
}
  0x1b   :  { %s496_s12 = scalar_lea.vmem %s32_s30, 512  ;;  %p501_p12 = scmp.lt.s32.totalorder %s32_s30, %s32_s30 }
  0x1c   :  { %p497_p11 = scmp.ne.s32.totalorder %s32_s30, %s496_s12  ;;  %p502_p13 = scmp.lt.s32.totalorder %s496_s12, %s496_s12 }
  0x1e   :  { %p503_p0 = por %p502_p13, %p501_p12 }
  0x20   :  { %p504_p1 = pnand %p503_p0, %p497_p11 }
  0x22   :  { %507 = shalt.err (!%p504_p1)
}
  0x23   :  { %s564_s0 = smov 128   ;;  %s565_s13 = smov 8  }
  0x24   :  { %37 = dma.hbm_to_vmem [thread:$0]  %s694_s1, 512, %s32_s30, [#allocation7], %s564_s0, %s564_s0, %s565_s13  }
  0x25   :  { %552 = dma.done.wait [#allocation4], 2048  }
  0x26   :  { %553 = vsyncadd [#allocation4], 4294965248 }
  0x27   :  { %554 = dma.done.wait [#allocation7], 512  }
  0x28   :  { %555 = vsyncadd [#allocation7], 4294966784  ;;  %v54_v0 = vld [vmem:[#allocation3 + $0x40] sm:$0xff]  ;;  %v55_v1 = vld [vmem:[#allocation3 + $0x48] sm:$0xff]  ;;  %v161_v24 = vlaneseq  ;;  %vm172_vm0 = vcmask 130112   ;;  %vm179_vm1 = vcmask 195712  }
  0x29   :  { %v46_v2 = vld [vmem:[#allocation3] sm:$0xff]  ;;  %v66_v3 = vadd.f32 %v55_v1, %v54_v0  ;;  %v47_v4 = vld [vmem:[#allocation3 + $0x8] sm:$0xff]  ;;  %v56_v5 = vld [vmem:[#allocation3 + $0x50] sm:$0xff]  ;;  %vm186_vm2 = vcmask 261312   ;;  %vm207_vm3 = vcmask 1041409   ;;  %vm210_vm4 = vcmask 254976  }
  0x2a   :  { %v57_v6 = vld [vmem:[#allocation3 + $0x58] sm:$0xff]  ;;  %v62_v7 = vadd.f32 %v47_v4, %v46_v2  ;;  %v48_v8 = vld [vmem:[#allocation3 + $0x10] sm:$0xff]  ;;  %v58_v12 = vld [vmem:[#allocation3 + $0x60] sm:$0xff]  ;;  %v162_v27 = vand.u32 127, %v161_v24  ;;  %v164_v34 = vshrl.u32 %v161_v24, 7  ;;  %vm568_vm5 = vmmov 0  }
  0x2b   :  { %v49_v9 = vld [vmem:[#allocation3 + $0x18] sm:$0xff]  ;;  %129 = vadd.xlane.f32.xlu1 %v66_v3  ;;  %v67_v10 = vadd.f32 %v57_v6, %v56_v5  ;;  %v59_v13 = vld [vmem:[#allocation3 + $0x68] sm:$0xff]  ;;  %v50_v14 = vld [vmem:[#allocation3 + $0x20] sm:$0xff]  ;;  %vm312_vm6 = vcmask 261120   ;;  %s570_s1 = smov [#allocation9]  }
  0x2c   :  { %121 = vadd.xlane.f32.xlu0 %v62_v7  ;;  %v63_v11 = vadd.f32 %v49_v9, %v48_v8  ;;  %v51_v15 = vld [vmem:[#allocation3 + $0x28] sm:$0xff]  ;;  %v68_v16 = vadd.f32 %v59_v13, %v58_v12  ;;  %v60_v18 = vld [vmem:[#allocation3 + $0x70] sm:$0xff]  ;;  %v61_v19 = vld [vmem:[#allocation3 + $0x78] sm:$0xff]  ;;  %v167_v29 = vadd.s32 4294967288, %v162_v27  ;;  %v174_v33 = vadd.s32 4294967280, %v162_v27  ;;  %s410_s16 = sshll.u32 %s570_s1, 4  ;;  %s411_s16 = int_to_ptr.vmem [resolvable:$true] %s410_s16 }
  0x2d   :  { %v64_v17 = vadd.f32 %v51_v15, %v50_v14  ;;  %v52_v20 = vld [vmem:[#allocation3 + $0x30] sm:$0xff]  ;;  %v53_v21 = vld [vmem:[#allocation3 + $0x38] sm:$0xff]  ;;  %v69_v22 = vadd.f32 %v61_v19, %v60_v18  ;;  %v181_v42 = vadd.s32 4294967272, %v162_v27  ;;  %v629_v46 = vsub.s32 %v162_v27, %v164_v34  ;;  %s508_s17 = scalar_lea.vmem %s411_s16, 32  ;;  %p513_p3 = scmp.lt.s32.totalorder %s411_s16, %s411_s16 }
  0x2e   :  { %v65_v23 = vadd.f32 %v53_v21, %v52_v20  ;;  %v623_v38 = vsub.s32 %v167_v29, %v164_v34  ;;  %v627_v44 = vsub.s32 %v174_v33, %v164_v34  ;;  %v219_v13 = vsub.s32 0, %v164_v34  ;;  %p509_p2 = scmp.ne.s32.totalorder %s411_s16, %s508_s17  ;;  %p514_p4 = scmp.lt.s32.totalorder %s508_s17, %s508_s17 }
  0x2f   :  { %131 = vadd.xlane.f32.xlu1 %v67_v10  ;;  %v632_v53 = vsub.s32 %v181_v42, %v164_v34  ;;  %v566_v10 = vmov 0   ;;  %v223_v14 = vsub.s32 1, %v164_v34 }
  0x30   :  { %123 = vadd.xlane.f32.xlu0 %v63_v11  ;;  %460 = vset.pattern.permute.xlu1 %v566_v10  ;;  %p515_p5 = por %p514_p4, %p513_p3 }
  0x31   :  { %461 = vset.pattern.permute.xlu0 %v566_v10 }
  0x32   :  { %p516_p6 = pnand %p515_p5, %p509_p2 }
  0x33   :  { %133 = vadd.xlane.f32.xlu1 %v68_v16 }
  0x34   :  { %125 = vadd.xlane.f32.xlu0 %v64_v17 }
  0x37   :  { %135 = vadd.xlane.f32.xlu1 %v69_v22 }
  0x38   :  { %127 = vadd.xlane.f32.xlu0 %v65_v23 }
  0xb8   :  { %v130_v25 = vpop.xlane.xlu1 %129 }
  0xb9   :  { %v122_v26 = vpop.xlane.xlu0 %121  ;;  %v141_v35 = vmul.f32 0.00390625, %v130_v25  ;;  %v308_v25 = vld [vmem:[#allocation6] sm:$0xff] }
  0xba   :  { %v137_v36 = vmul.f32 0.00390625, %v122_v26  ;;  %v309_v26 = vld [vmem:[#allocation6 + $0x8] sm:$0xff] }
  0xbb   :  { %v149_v47 = vmul.f32 %v141_v35, %v141_v35  ;;  %v443_v27 = vpack.c.bf16 %v309_v26, %v308_v25 }
  0xbc   :  { %v132_v28 = vpop.xlane.xlu1 %131  ;;  %v145_v49 = vmul.f32 %v137_v36, %v137_v36 }
  0xbd   :  { %v621_v30 = vmul.f32 0.00390625, %v132_v28  ;;  %v124_v31 = vpop.xlane.xlu0 %123  ;;  %v191_v59 = vrot.slane %v149_v47, %v629_v46  ;;  %v567_v28 = vmov 0.0|0.0  }
  0xbe   :  { %v138_v32 = vmul.f32 0.00390625, %v124_v31  ;;  %v166_v62 = vrot.slane %v145_v49, %v629_v46  ;;  %442 = vmatprep.subr.bf16.mxu0 %v567_v28  ;;  %v310_v31 = vld [vmem:[#allocation6 + $0x10] sm:$0xff] }
  0xbf   :  { %v150_v39 = vmul.f32 %v621_v30, %v621_v30  ;;  %444 = vmatpush3.bf16.msra.mxu0 %v443_v27 }
  0xc0   :  { %v134_v37 = vpop.xlane.xlu1 %133  ;;  %v146_v43 = vmul.f32 %v138_v32, %v138_v32  ;;  %445 = vmatprep.subr.bf16.mxu0 %v567_v28 }
  0xc1   :  { %v143_v40 = vmul.f32 0.00390625, %v134_v37  ;;  %v126_v41 = vpop.xlane.xlu0 %125  ;;  %v195_v52 = vrot.slane %v150_v39, %v623_v38 }
  0xc2   :  { %v139_v45 = vmul.f32 0.00390625, %v126_v41  ;;  %v171_v56 = vrot.slane %v146_v43, %v623_v38 }
  0xc3   :  { %v151_v48 = vmul.f32 %v143_v40, %v143_v40  ;;  %v196_v1 = vsel %vm172_vm0, %v195_v52, %v191_v59 }
  0xc4   :  { %v147_v50 = vmul.f32 %v139_v45, %v139_v45  ;;  %v136_v51 = vpop.xlane.xlu1 %135  ;;  %v173_v3 = vsel %vm172_vm0, %v171_v56, %v166_v62 }
  0xc5   :  { %v144_v54 = vmul.f32 0.00390625, %v136_v51  ;;  %v128_v55 = vpop.xlane.xlu0 %127  ;;  %v200_v57 = vrot.slane %v151_v48, %v627_v44 }
  0xc6   :  { %v140_v58 = vmul.f32 0.00390625, %v128_v55  ;;  %v178_v60 = vrot.slane %v147_v50, %v627_v44 }
  0xc7   :  { %v152_v61 = vmul.f32 %v144_v54, %v144_v54  ;;  %v201_v4 = vsel %vm179_vm1, %v200_v57, %v196_v1 }
  0xc8   :  { %v148_v63 = vmul.f32 %v140_v58, %v140_v58  ;;  %v180_v5 = vsel %vm179_vm1, %v178_v60, %v173_v3 }
  0xc9   :  { %v205_v0 = vrot.slane %v152_v61, %v632_v53 }
  0xca   :  { %v185_v2 = vrot.slane %v148_v63, %v632_v53 }
  0xcb   :  { %v206_v6 = vsel %vm186_vm2, %v205_v0, %v201_v4 }
  0xcc   :  { %v187_v7 = vsel %vm186_vm2, %v185_v2, %v180_v5 }
  0xcd   :  { %v208_v8 = vsel %vm207_vm3, %v206_v6, %v187_v7 }
  0xce   :  { %v211_v9 = vsel %vm210_vm4, %v208_v8, 0.0 }
  0xcf   :  { %212 = vadd.xlane.f32.xlu0 %v211_v9 }
 0x15c   :  { %v213_v11 = vpop.xlane.xlu0 %212 }
 0x15d   :  { %v214_v12 = vmax.f32 %v213_v11, 1e-24 }
 0x15f   :  { %462 = vrsqrt.f32 %v214_v12 }
 0x169   :  { %v463_v15 = vpop.eup %462 }
 0x16a   :  { %v220_v16 = vrot.slane %v463_v15, %v219_v13  ;;  %v224_v19 = vrot.slane %v463_v15, %v223_v14 }
 0x16c   :  { %v228_v17 = vmul.f32 %v220_v16, %v138_v32  ;;  %v227_v18 = vmul.f32 %v220_v16, %v137_v36  ;;  %v231_v20 = vmul.f32 %v224_v19, %v141_v35  ;;  %v232_v21 = vmul.f32 %v224_v19, %v621_v30  ;;  %v311_v32 = vld [vmem:[#allocation6 + $0x18] sm:$0xff] }
 0x16d   :  { %v229_v22 = vmul.f32 %v220_v16, %v139_v45  ;;  %v233_v23 = vmul.f32 %v224_v19, %v143_v40  ;;  %v230_v24 = vmul.f32 %v220_v16, %v140_v58  ;;  %v234_v29 = vmul.f32 %v224_v19, %v144_v54 }
 0x16e   :  { %247 = vperm.xlu0 %461, %v228_v17   ;;  %244 = vperm.xlu1 %460, %v227_v18   ;;  %v446_v33 = vpack.c.bf16 %v311_v32, %v310_v31  ;;  %v569_v30 = vmov 0.0  }
 0x16f   :  { %439 = vmatprep.mubr.msk.f32.mxu0 %vm568_vm5, %v569_v30 }
 0x170   :  { %447 = vmatpush3.bf16.msra.mxu0 %v446_v33 }
 0x172   :  { %256 = vperm.xlu1 %460, %v231_v20  }
 0x176   :  { %259 = vperm.xlu1 %460, %v232_v21  }
 0x17a   :  { %250 = vperm.xlu1 %460, %v229_v22  }
 0x17e   :  { %262 = vperm.xlu1 %460, %v233_v23  }
 0x182   :  { %253 = vperm.xlu1 %460, %v230_v24  }
 0x186   :  { %265 = vperm.xlu1 %460, %v234_v29  }
 0x1ed   :  { %v245_v34 = vpop.permute.xlu1 %244  ;;  %v248_v40 = vpop.permute.xlu0 %247 }
 0x1ee   :  { %v274_v42 = vrot.slane %v248_v40, %v623_v38  ;;  %v270_v43 = vrot.slane %v245_v34, %v629_v46 }
 0x1f0   :  { %v275_v52 = vsel %vm172_vm0, %v274_v42, %v270_v43 }
 0x1f1   :  { %v257_v35 = vpop.permute.xlu1 %256 }
 0x1f2   :  { %v289_v49 = vrot.slane %v257_v35, %v629_v46 }
 0x1f5   :  { %v260_v36 = vpop.permute.xlu1 %259 }
 0x1f6   :  { %v293_v45 = vrot.slane %v260_v36, %v623_v38 }
 0x1f8   :  { %v294_v54 = vsel %vm172_vm0, %v293_v45, %v289_v49 }
 0x1f9   :  { %v251_v37 = vpop.permute.xlu1 %250 }
 0x1fa   :  { %v279_v47 = vrot.slane %v251_v37, %v627_v44 }
 0x1fc   :  { %v280_v56 = vsel %vm179_vm1, %v279_v47, %v275_v52 }
 0x1fd   :  { %v263_v39 = vpop.permute.xlu1 %262 }
 0x1fe   :  { %v298_v48 = vrot.slane %v263_v39, %v627_v44 }
 0x200   :  { %v299_v57 = vsel %vm179_vm1, %v298_v48, %v294_v54 }
 0x201   :  { %v254_v41 = vpop.permute.xlu1 %253 }
 0x202   :  { %v284_v50 = vrot.slane %v254_v41, %v632_v53 }
 0x204   :  { %v285_v38 = vsel %vm186_vm2, %v284_v50, %v280_v56 }
 0x205   :  { %v266_v51 = vpop.permute.xlu1 %265 }
 0x206   :  { %v303_v55 = vrot.slane %v266_v51, %v632_v53 }
 0x208   :  { %v304_v44 = vsel %vm186_vm2, %v303_v55, %v299_v57 }
 0x209   :  { %v305_v46 = vsel %vm207_vm3, %v304_v44, %v285_v38 }
 0x20a   :  { %440 = vmatmul.mubr.msk.f32.vlgmr.msra.gmra.mrb[0].mxu0 %vm312_vm6, %v305_v46  ;;  %307 = vst.msk [vmem:[#allocation9] sm:$0x3] %vm210_vm4, %v305_v46 }
 0x20b   :  { %519 = shalt.err (!%p516_p6)
}
 0x20c   :  { %s520_s20 = scalar_lea.hbm %s697_s4, 32 }
 0x20d   :  { %p521_p7 = scmp.ne.s32.totalorder %s697_s4, %s520_s20  ;;  %p524_p8 = scmp.lt.u32.totalorder %s520_s20, %s697_s4 }
 0x20f   :  { %p526_p9 = pnand %p524_p8, %p521_p7 }
 0x211   :  { %529 = shalt.err (!%p526_p9)
}
 0x212   :  { %413 = dma.vmem_to_hbm [thread:$0]  %s411_s16, 32, %s697_s4, [#allocation10]   ;;  %v425_v53 = vld [vmem:[%s695_s2] ss:$0 sm:$0xff] }
 0x213   :  { %s571_s29 = smov [#allocation8]  }
 0x214   :  { %s400_s30 = sshll.u32 %s571_s29, 4  ;;  %s401_s30 = int_to_ptr.vmem [resolvable:$true] %s400_s30 }
 0x215   :  { %s530_s5 = scalar_lea.vmem %s401_s30, 32  ;;  %p535_p11 = scmp.lt.s32.totalorder %s401_s30, %s401_s30 }
 0x216   :  { %p531_p10 = scmp.ne.s32.totalorder %s401_s30, %s530_s5  ;;  %p536_p12 = scmp.lt.s32.totalorder %s530_s5, %s530_s5 }
 0x218   :  { %p537_p13 = por %p536_p12, %p535_p11 }
 0x21a   :  { %p538_p0 = pnand %p537_p13, %p531_p10 }
 0x2dd   :  { %v381_v58 = vpop.f32.mrb[0].mxu0 }
 0x2de   :  { %v392_v59 = vmul.f32 %v425_v53, %v381_v58  ;;  %v441_v60 = vpop.f32.mrb[1].mxu0 }
 0x2e0   :  { %393 = vst [vmem:[#allocation8] sm:$0x3] %v392_v59 }
 0x2e1   :  { %541 = shalt.err (!%p538_p0)
}
 0x2e2   :  { %s542_s7 = scalar_lea.hbm %s696_s3, 32 }
 0x2e3   :  { %p543_p1 = scmp.ne.s32.totalorder %s696_s3, %s542_s7  ;;  %p546_p2 = scmp.lt.u32.totalorder %s542_s7, %s696_s3 }
 0x2e5   :  { %p548_p3 = pnand %p546_p2, %p543_p1 }
 0x2e7   :  { %551 = shalt.err (!%p548_p3)
}
 0x2e8   :  { %403 = dma.vmem_to_hbm [thread:$0]  %s401_s30, 32, %s696_s3, [#allocation5]  }
 0x2e9   :  { %556 = dma.done.wait [#allocation5], 32  }
 0x2ea   :  { %557 = vsyncadd [#allocation5], 4294967264 }
 0x2eb   :  { %558 = dma.done.wait [#allocation10], 32  }
 0x2ec   :  { %559 = vsyncadd [#allocation10], 4294967264 }
 0x2ed   :  { %420 = vsyncpa [#allocation4], 1 }
 0x2ee   :  { %421 = vsyncpa [#allocation7], 1 }
 0x2ef   :  { %422 = vsyncpa [#allocation5], 1 }
 0x2f0   :  { %423 = vsyncpa [#allocation10], 1 }

</bundles_post_ra>
